<compile_context>
chip_gen: v7x
topology: tpu7x:2x2x1
jax: 0.10.0
libtpu: 0.0.40
codegen_flags: <defaults>
</compile_context>

<pallas_src>
import math

import jax
import jax.numpy as jnp
from jax.experimental import pallas as pl
from jax.experimental.pallas import tpu as pltpu


_LANES = 128
_SUBLANES = 8
_MAX_COL_TILE = 32768                 # elements per row chunk (128 KiB in f32)
_BLOCK_TARGET_BYTES = 2 * 1024 * 1024  # ~2 MiB per block (double-buffered by Pallas)


def make_pe_table(max_len, d_model, dtype=jnp.float32):
    """Deterministic sinusoidal PE table, identical to the PyTorch __init__."""
    position = jnp.arange(max_len, dtype=jnp.float32)[:, None]                   # [L, 1]
    div_term = jnp.exp(
        jnp.arange(0, d_model, 2, dtype=jnp.float32) * (-(math.log(10000.0) / d_model))
    )                                                                             # [D/2]
    ang = position * div_term                                                     # [L, D/2]
    pe = jnp.zeros((max_len, d_model), jnp.float32)
    pe = pe.at[:, 0::2].set(jnp.sin(ang))
    pe = pe.at[:, 1::2].set(jnp.cos(ang))
    return pe.astype(dtype)


def _pick_tile(n, align, max_elems):
    """Largest divisor of n that is a multiple of `align` and <= max_elems.

    Falls back to the full extent n (always a legal BlockSpec dim) when n is
    already small enough or no aligned divisor exists."""
    if n <= max_elems:
        return n
    if n % align == 0:
        t = (max_elems // align) * align
        while t >= align:
            if n % t == 0:
                return t
            t -= align
    return n


def _add_pe_kernel(x_ref, pe_ref, o_ref):
    # x_ref: (tB, tC), pe_ref: (1, tC) -> broadcasts over the batch rows.
    o_ref[...] = x_ref[...] + pe_ref[...]


def _add_pe_dropout_kernel(x_ref, pe_ref, scale_ref, o_ref):
    # scale_ref holds 0 or 1/keep_prob -> fused inverted dropout (single multiply).
    o_ref[...] = (x_ref[...] + pe_ref[...]) * scale_ref[...]


def positional_encoding(x, pe, *, p_dropout=0.1, train=True, rng_key=None):
    """Equivalent to PyTorch PositionalEncoding.forward; x: [B, S, D] -> [B, S, D]."""
    B, S, D = x.shape
    C = S * D
    itemsize = jnp.dtype(x.dtype).itemsize

    # Lane-dense flattening: [B, S, D] -> [B, S*D]; pe[:S] -> [1, S*D] broadcasts
    # across batch rows exactly as in the 3-D layout.
    x2 = x.reshape(B, C)
    pe2 = pe[:S].astype(x.dtype).reshape(1, C)

    tC = _pick_tile(C, _LANES, _MAX_COL_TILE)
    row_cap = max(_SUBLANES, _BLOCK_TARGET_BYTES // max(1, tC * itemsize))
    tB = _pick_tile(B, _SUBLANES, row_cap)
    # Column tiles OUTER, batch tiles INNER: pe's block index (0, j) is constant
    # across consecutive inner steps, so its DMA is not re-issued per batch tile.
    grid = (C // tC, B // tB)

    x_spec = pl.BlockSpec((tB, tC), lambda j, i: (i, j))
    pe_spec = pl.BlockSpec((1, tC), lambda j, i: (0, j))
    out_spec = pl.BlockSpec((tB, tC), lambda j, i: (i, j))

    compiler_params = pltpu.CompilerParams(
        dimension_semantics=("parallel", "parallel"),
        vmem_limit_bytes=32 * 1024 * 1024,
    )
    out_shape = jax.ShapeDtypeStruct((B, C), x.dtype)

    apply_dropout = bool(train) and float(p_dropout) > 0.0
    if not apply_dropout:
        out2 = pl.pallas_call(
            _add_pe_kernel,
            out_shape=out_shape,
            grid_spec=pl.GridSpec(grid=grid, in_specs=[x_spec, pe_spec],
                                  out_specs=out_spec),
            compiler_params=compiler_params,
        )(x2, pe2)
    else:
        keep_prob = 1.0 - float(p_dropout)
        if rng_key is None:
            rng_key = jax.random.PRNGKey(0)
        keep = jax.random.bernoulli(rng_key, keep_prob, (B, C))
        scale2 = keep.astype(x.dtype) * jnp.asarray(1.0 / keep_prob, x.dtype)
        out2 = pl.pallas_call(
            _add_pe_dropout_kernel,
            out_shape=out_shape,
            grid_spec=pl.GridSpec(grid=grid, in_specs=[x_spec, pe_spec, x_spec],
                                  out_specs=out_spec),
            compiler_params=compiler_params,
        )(x2, pe2, scale2)

    return out2.reshape(B, S, D)


if __name__ == "__main__":
    B, S, D = 2, 8, 32
    MAX_LEN = 64
    P_DROPOUT = 0.1

    key = jax.random.PRNGKey(0)
    kx, kd = jax.random.split(key)
    x = jax.random.normal(kx, (B, S, D), dtype=jnp.float32)
    pe = make_pe_table(MAX_LEN, D)

    # Eval mode (dropout = identity): must match x + pe exactly.
    out_eval = jax.block_until_ready(
        positional_encoding(x, pe, p_dropout=P_DROPOUT, train=False)
    )
    ref = x + pe[None, :S, :]
    assert out_eval.shape == (B, S, D)
    assert jnp.allclose(out_eval, ref, atol=1e-6), "eval-mode mismatch"

    # Train mode: mask is a deterministic function of kd, so we can check exactly.
    out_train = jax.block_until_ready(
        positional_encoding(x, pe, p_dropout=P_DROPOUT, train=True, rng_key=kd)
    )
    keep_prob = 1.0 - P_DROPOUT
    keep_mask = jax.random.bernoulli(kd, keep_prob, (B, S * D)).reshape(B, S, D)
    ref_train = jnp.where(keep_mask, ref * (1.0 / keep_prob), 0.0)
    assert out_train.shape == (B, S, D)
    assert jnp.allclose(out_train, ref_train, atol=1e-5), "train-mode mismatch"

    print("KERNEL_OK")
</pallas_src>

<mosaic_0001>
module attributes {stable_mosaic.version = 11 : i64} {
  func.func @_add_pe_kernel(%arg0: i32, %arg1: i32, %arg2: memref<2x256xf32, #tpu.memory_space<vmem>>, %arg3: memref<1x256xf32, #tpu.memory_space<vmem>>, %arg4: memref<2x256xf32, #tpu.memory_space<vmem>>) attributes {dimension_semantics = [#tpu.dimension_semantics<parallel>, #tpu.dimension_semantics<parallel>], iteration_bounds = array<i64: 1, 1>, scalar_prefetch = 0 : i64, scratch_operands = 0 : i64, tpu.core_type = #tpu.core_type<tc>, window_params = [{transform_indices = @transform_0, window_bounds = array<i64: 2, 256>}, {transform_indices = @transform_1, window_bounds = array<i64: 1, 256>}, {transform_indices = @transform_2, window_bounds = array<i64: 2, 256>}]} {
    %c0 = arith.constant 0 : index
    %c0_0 = arith.constant 0 : index
    %0 = vector.load %arg2[%c0, %c0_0] : memref<2x256xf32, #tpu.memory_space<vmem>>, vector<2x256xf32>
    %c0_1 = arith.constant 0 : index
    %c0_2 = arith.constant 0 : index
    %1 = vector.load %arg3[%c0_1, %c0_2] : memref<1x256xf32, #tpu.memory_space<vmem>>, vector<1x256xf32>
    %2 = vector.broadcast %1 : vector<1x256xf32> to vector<2x256xf32>
    %3 = arith.addf %0, %2 : vector<2x256xf32>
    %c0_3 = arith.constant 0 : index
    %c0_4 = arith.constant 0 : index
    %4 = vector.load %arg4[%c0_3, %c0_4] : memref<2x256xf32, #tpu.memory_space<vmem>>, vector<2x256xf32>
    tpu.vector_store %arg4[%c0_3, %c0_4], %3 {strides = array<i32>} : memref<2x256xf32, #tpu.memory_space<vmem>>, vector<2x256xf32>,
    return
  }
  func.func @transform_0(%arg0: i32, %arg1: i32) -> (i32, i32) {
    %c0_i32 = arith.constant 0 : i32
    return %arg1, %arg0 : i32, i32
  }
  func.func @transform_1(%arg0: i32, %arg1: i32) -> (i32, i32) {
    %c0_i32 = arith.constant 0 : i32
    %c0_i32_0 = arith.constant 0 : i32
    return %c0_i32, %arg0 : i32, i32
  }
  func.func @transform_2(%arg0: i32, %arg1: i32) -> (i32, i32) {
    %c0_i32 = arith.constant 0 : i32
    return %arg1, %arg0 : i32, i32
  }
}

</mosaic_0001>

<bundles_post_ra>
// kernel: tpu_custom_call.1
= control target key start
LH: loop header
LB: loop body
LE: loop exit
PB: predicated region body
PF: predicated region fallthrough
CT: control target
= control target key end

     0   :  { %7 = vsyncpa [#allocation3], 0  ;;  %s157_s0 = inlined_call_operand.hbm [shape: f32[2,256], index: 0, kind: input, shape index: {}]   ;;  %s158_s1 = inlined_call_operand.vmem [shape: f32[1,256], index: 1, kind: input, shape index: {}]   ;;  %s159_s2 = inlined_call_operand.hbm [shape: f32[2,256], index: 2, kind: output, shape index: {}]  }
   0x1   :  { %8 = vsyncpa [#allocation4], 0  ;;  %s112_s9 = smov [#allocation2]   ;;  %s64_s13 = scalar_lea.hbm %s157_s0, 64 }
   0x2   :  { %s15_s10 = sshll.u32 %s112_s9, 4  ;;  %p65_p0 = scmp.ne.s32.totalorder %s157_s0, %s64_s13  ;;  %s16_s10 = int_to_ptr.vmem [resolvable:$true] %s15_s10 }
   0x3   :  { %p68_p1 = scmp.lt.u32.totalorder %s64_s13, %s157_s0 }
   0x5   :  { %p70_p2 = pnand %p68_p1, %p65_p0 }
   0x7   :  { %73 = shalt.err (!%p70_p2)
}
   0x8   :  { %s74_s18 = scalar_lea.vmem %s16_s10, 64  ;;  %p79_p4 = scmp.lt.s32.totalorder %s16_s10, %s16_s10 }
   0x9   :  { %p75_p3 = scmp.ne.s32.totalorder %s16_s10, %s74_s18  ;;  %p80_p5 = scmp.lt.s32.totalorder %s74_s18, %s74_s18 }
   0xb   :  { %p81_p6 = por %p80_p5, %p79_p4 }
   0xd   :  { %p82_p7 = pnand %p81_p6, %p75_p3 }
   0xf   :  { %85 = shalt.err (!%p82_p7)
}
  0x10   :  { %18 = dma.hbm_to_vmem [thread:$0]  %s157_s0, 64, %s16_s10, [#allocation3]  }
  0x11   :  { %108 = dma.done.wait [#allocation3], 64  }
  0x12   :  { %109 = vsyncadd [#allocation3], 4294967232  ;;  %v27_v0 = vlaneseq  ;;  %v113_v1 = vmov 1983009808   ;;  %v25_v7 = vld [vmem:[%s158_s1] sm:$0x3] }
  0x13   :  { %v37_v2 = vunpack.c.l.s4 %v113_v1  ;;  %v24_v12 = vld [vmem:[#allocation2] sm:$0xf]  ;;  %s114_s23 = smov [#allocation5]  }
  0x14   :  { %v28_v3 = vshrl.u32 %v27_v0, 7  ;;  %s52_s0 = sshll.u32 %s114_s23, 4  ;;  %s53_s0 = int_to_ptr.vmem [resolvable:$true] %s52_s0 }
  0x15   :  { %v38_v6 = vunpack.c.0.s8 %v37_v2  ;;  %s86_s24 = scalar_lea.vmem %s53_s0, 64  ;;  %p91_p9 = scmp.lt.s32.totalorder %s53_s0, %s53_s0 }
  0x16   :  { %v29_v4 = vsub.s32 0, %v28_v3  ;;  %v33_v5 = vsub.s32 1, %v28_v3  ;;  %p87_p8 = scmp.ne.s32.totalorder %s53_s0, %s86_s24  ;;  %p92_p10 = scmp.lt.s32.totalorder %s86_s24, %s86_s24 }
  0x17   :  { %v41_v10 = vsub.s32 %v38_v6, %v28_v3 }
  0x18   :  { %v30_v8 = vrot.slane %v25_v7, %v29_v4  ;;  %v34_v9 = vrot.slane %v25_v7, %v33_v5  ;;  %p93_p11 = por %p92_p10, %p91_p9 }
  0x1a   :  { %v35_v11 = vcombine.low %v30_v8, %v34_v9  ;;  %p94_p12 = pnand %p93_p11, %p87_p8 }
  0x1c   :  { %v42_v13 = vrot.slane %v35_v11, %v41_v10 }
  0x1e   :  { %v44_v14 = vadd.f32 %v42_v13, %v24_v12 }
  0x20   :  { %45 = vst [vmem:[#allocation5] sm:$0xf] %v44_v14 }
  0x21   :  { %97 = shalt.err (!%p94_p12)
}
  0x22   :  { %s98_s26 = scalar_lea.hbm %s159_s2, 64 }
  0x23   :  { %p99_p13 = scmp.ne.s32.totalorder %s159_s2, %s98_s26  ;;  %p102_p0 = scmp.lt.u32.totalorder %s98_s26, %s159_s2 }
  0x25   :  { %p104_p1 = pnand %p102_p0, %p99_p13 }
  0x27   :  { %107 = shalt.err (!%p104_p1)
}
  0x28   :  { %55 = dma.vmem_to_hbm [thread:$0]  %s53_s0, 64, %s159_s2, [#allocation4]  }
  0x29   :  { %110 = dma.done.wait [#allocation4], 64  }
  0x2a   :  { %111 = vsyncadd [#allocation4], 4294967232 }
  0x2b   :  { %59 = vsyncpa [#allocation3], 1 }
  0x2c   :  { %60 = vsyncpa [#allocation4], 1 }

</bundles_post_ra>
